<compile_context>
chip_gen: v6e
topology: v6e:2x2x1
jax: 0.10.0
libtpu: 0.0.40
codegen_flags: <defaults>
</compile_context>

<pallas_src>
import jax
import jax.numpy as jnp
from jax.experimental import pallas as pl
from jax.experimental.pallas import tpu as pltpu


def _make_kernel(C, TS, S_rows, JI, R, LANE=128):
    """Builds the per-tile kernel. One (TS, 128) spatial tile of one batch element per step.

    Kernel args:
      w_ref:   SMEM (C,)             class weights (scalar-prefetched)
      x_ref:   VMEM (1, C, TS, 128)  logits tile (input dtype; upcast in-kernel)
      t_ref:   VMEM (1, 1, TS, 128)  int32 labels (-1 marks lane padding)
      out_ref: VMEM (1, 1, R, 128)   per-(batch, chunk) lane-partial statistics
               rows: [0]=sum(w*ce), [1]=sum(w), [2:2+C]=intersection,
                     [2+C:2+2C]=softmax sum, [2+2C:2+3C]=target count
      e_ref:   VMEM (C, TS, 128)     f32 scratch holding exp(x - m) between passes
    """

    def kernel(w_ref, x_ref, t_ref, out_ref, e_ref):
        pj = pl.program_id(1)
        ji = pl.program_id(2)

        @pl.when(ji == 0)
        def _():
            out_ref[...] = jnp.zeros_like(out_ref)

        # Positional row mask: the last S-tile may be ragged (read junk past S_rows).
        row0 = (pj * JI + ji) * TS
        row_ids = jax.lax.broadcasted_iota(jnp.int32, (TS, LANE), 0) + row0
        row_ok = row_ids < S_rows

        t = jnp.where(row_ok, t_ref[0, 0], -1)      # junk labels -> dropped
        valid = t >= 0

        # ---- pass 1: channel max (dense (TS,128) VPU tiles) ----
        m = x_ref[0, 0].astype(jnp.float32)
        for c in range(1, C):
            m = jnp.maximum(m, x_ref[0, c].astype(jnp.float32))

        # ---- pass 2: exp -> VMEM scratch, softmax denominator, label-gathered stats ----
        # Fused so x[c] is loaded exactly once here (x read from VMEM only twice overall).
        zero = jnp.zeros((TS, LANE), jnp.float32)
        s = zero
        x_sel = zero
        w_pix = zero
        tsum_rows = []
        for c in range(C):
            xc = x_ref[0, c].astype(jnp.float32)
            mask_c = t == c
            x_sel = jnp.where(mask_c, xc, x_sel)
            w_pix = jnp.where(mask_c, w_ref[c], w_pix)
            tsum_rows.append(jnp.sum(mask_c.astype(jnp.float32), axis=0, keepdims=True))
            e_c = jnp.where(valid, jnp.exp(xc - m), 0.0)   # sanitize ragged-tile junk -> 0
            s = s + e_c
            e_ref[c] = e_c                                  # bound vreg pressure at large TS

        lse = jnp.log(s)
        r0 = pl.reciprocal(s, approx=True)
        inv_s = r0 * (2.0 - s * r0)                         # one Newton step -> ~f32 accuracy
        inv_valid = jnp.where(valid, inv_s, 0.0)

        # per-pixel weighted CE: -log p[target] = m + lse - x[target]
        ce_pix = jnp.where(valid, m + lse - x_sel, 0.0)
        rows = [jnp.sum(w_pix * ce_pix, axis=0, keepdims=True),
                jnp.sum(w_pix, axis=0, keepdims=True)]

        # ---- pass 3: per-class softmax stats from the e-scratch ----
        inter_rows, psum_rows = [], []
        for c in range(C):
            e_c = e_ref[c]
            inter_rows.append(jnp.sum(e_c * jnp.where(t == c, inv_s, 0.0),
                                      axis=0, keepdims=True))
            psum_rows.append(jnp.sum(e_c * inv_valid, axis=0, keepdims=True))

        # Single batched accumulation into the VMEM-resident stats block.
        stacked = jnp.concatenate(rows + inter_rows + psum_rows + tsum_rows, axis=0)  # (R,128)
        out_ref[0, 0] = out_ref[0, 0] + stacked

    return kernel


def combined_loss(outputs_nchw, targets_nhw, class_weights, *, vmem_budget_bytes=20 << 20):
    """outputs: (N, C, H, W) float logits (f32 or bf16); targets: (N, H, W) int labels;
    class_weights: (C,)."""
    N, C, H, W = outputs_nchw.shape
    HW = H * W
    LANE = 128

    x = outputs_nchw.reshape(N, C, HW)               # keep input dtype on the DMA (bf16 stays bf16)
    t = targets_nhw.astype(jnp.int32).reshape(N, HW)

    S = -(-HW // LANE)                               # number of 128-lane spatial rows
    if S * LANE != HW:
        # TODO(synk): lane-remainder pad still copies the tensors once; a flat-HW BlockSpec
        # with full in-kernel lane masking would remove it.
        x = jnp.pad(x, ((0, 0), (0, 0), (0, S * LANE - HW)))
        t = jnp.pad(t, ((0, 0), (0, S * LANE - HW)), constant_values=-1)
    x = x.reshape(N, C, S, LANE)
    t = t.reshape(N, 1, S, LANE)
    w = class_weights.astype(jnp.float32).reshape(C)

    # Tile rows from a VMEM budget: double-buffered inputs + e-scratch + ~16 f32 temporaries.
    xb = x.dtype.itemsize
    per_row = (2 * (C * xb + 4) + C * 4 + 16 * 4) * LANE
    TS = max(16, min(512, (vmem_budget_bytes // per_row) // 16 * 16))
    TS = S if S <= TS else TS                        # small images: one tile covering all of S
    num_j = -(-S // TS)

    # v7x: when the batch axis cannot feed both TensorCores, split the spatial tiles across a
    # second "parallel" grid axis (a no-op on single-core v5e/v6e).
    if N == 1 and num_j >= 2 and num_j % 2 == 0:
        PJ, JI = 2, num_j // 2
    else:
        PJ, JI = 1, num_j

    R = 2 + 3 * C
    kernel = _make_kernel(C, TS, S, JI, R, LANE)

    stats = pl.pallas_call(
        kernel,
        out_shape=jax.ShapeDtypeStruct((N, PJ, R, LANE), jnp.float32),
        grid_spec=pltpu.PrefetchScalarGridSpec(
            num_scalar_prefetch=1,                   # class weights -> SMEM
            grid=(N, PJ, JI),
            in_specs=[
                pl.BlockSpec((1, C, TS, LANE), lambda n, pj, ji, w_s: (n, 0, pj * JI + ji, 0)),
                pl.BlockSpec((1, 1, TS, LANE), lambda n, pj, ji, w_s: (n, 0, pj * JI + ji, 0)),
            ],
            out_specs=pl.BlockSpec((1, 1, R, LANE), lambda n, pj, ji, w_s: (n, pj, 0, 0)),
            scratch_shapes=[pltpu.VMEM((C, TS, LANE), jnp.float32)],
        ),
        compiler_params=pltpu.CompilerParams(
            dimension_semantics=("parallel", "parallel", "arbitrary"),
            vmem_limit_bytes=32 * 1024 * 1024),      # explicit; fits v7x's 64 MiB physical
    )(w, x, t)

    # Tiny epilogue in plain JAX.
    part = stats.sum(axis=(1, 3))                    # (N, R): fold PJ chunks + lane partials
    ce_num = jnp.sum(part[:, 0])
    ce_den = jnp.sum(part[:, 1])
    inter = part[:, 2:2 + C]                         # (N, C)
    p_sum = part[:, 2 + C:2 + 2 * C]
    t_sum = part[:, 2 + 2 * C:2 + 3 * C]

    ce = jnp.where(ce_den > 0, ce_num / ce_den, 0.0)
    pt = jnp.exp(-ce)
    focal = (1.0 - pt) ** 2 * ce                     # gamma = 2.0
    smooth = 1.0
    dice = 1.0 - (2.0 * inter + smooth) / (p_sum + t_sum + smooth)
    dice = dice * w[None, :]
    return focal + dice.mean()


def combined_loss_reference(outputs, targets, class_weights):
    """Pure-JAX reference mirroring the PyTorch CombinedLoss forward."""
    N, C, H, W = outputs.shape
    logp = jax.nn.log_softmax(outputs, axis=1)                         # (N, C, H, W)
    oh = jnp.transpose(jax.nn.one_hot(targets, C, dtype=jnp.float32),
                       (0, 3, 1, 2))                                   # (N, C, H, W)
    ce_pix = -jnp.sum(oh * logp, axis=1)                               # (N, H, W)
    w_pix = class_weights[targets]                                     # (N, H, W)
    ce = jnp.sum(w_pix * ce_pix) / jnp.sum(w_pix)
    pt = jnp.exp(-ce)
    focal = (1.0 - pt) ** 2 * ce
    p = jax.nn.softmax(outputs, axis=1)
    inter = jnp.sum(p * oh, axis=(2, 3))                               # (N, C)
    dice = 1.0 - (2.0 * inter + 1.0) / (jnp.sum(p, axis=(2, 3)) +
                                        jnp.sum(oh, axis=(2, 3)) + 1.0)
    dice = dice * class_weights[None, :]
    return focal + dice.mean()


if __name__ == "__main__":
    key = jax.random.PRNGKey(0)
    k1, k2, k3, k4 = jax.random.split(key, 4)

    # Test 1: small shapes implied by the module (N=2, C=4, 16x16), f32.
    N, C, H, W = 2, 4, 16, 16
    outputs = jax.random.normal(k1, (N, C, H, W), dtype=jnp.float32)
    targets = jax.random.randint(k2, (N, H, W), 0, C, dtype=jnp.int32)
    class_weights = jnp.array([1.0, 2.0, 0.5, 1.5], dtype=jnp.float32)

    loss_fn = jax.jit(combined_loss)
    loss = jax.block_until_ready(loss_fn(outputs, targets, class_weights))
    ref = jax.block_until_ready(combined_loss_reference(outputs, targets, class_weights))
    assert jnp.isfinite(loss), "kernel produced non-finite loss"
    assert jnp.allclose(loss, ref, rtol=1e-4, atol=1e-5), (loss, ref)

    # Test 1b: bf16 logits stay bf16 through the DMA and are upcast per tile in-kernel.
    out_bf16 = outputs.astype(jnp.bfloat16)
    loss_bf = jax.block_until_ready(loss_fn(out_bf16, targets, class_weights))
    ref_bf = jax.block_until_ready(
        combined_loss_reference(out_bf16.astype(jnp.float32), targets, class_weights))
    assert jnp.allclose(loss_bf, ref_bf, rtol=1e-4, atol=1e-5), (loss_bf, ref_bf)

    # Test 2: N=1, HW not a multiple of 128 -> exercises the lane-remainder pad, the ragged
    # last tile's positional masking, and the v7x spatial-parallel grid split.
    N2, C2, H2, W2 = 1, 3, 300, 300
    out2 = jax.random.normal(k3, (N2, C2, H2, W2), dtype=jnp.float32)
    tgt2 = jax.random.randint(k4, (N2, H2, W2), 0, C2, dtype=jnp.int32)
    w2 = jnp.array([0.7, 1.3, 1.0], dtype=jnp.float32)
    loss2 = jax.block_until_ready(jax.jit(combined_loss)(out2, tgt2, w2))
    ref2 = jax.block_until_ready(combined_loss_reference(out2, tgt2, w2))
    assert jnp.isfinite(loss2), "kernel produced non-finite loss (test 2)"
    assert jnp.allclose(loss2, ref2, rtol=1e-4, atol=1e-5), (loss2, ref2)

    print("KERNEL_OK")
</pallas_src>

<mosaic_0001>
module attributes {stable_mosaic.version = 11 : i64} {
  func.func @kernel(%arg0: i32, %arg1: i32, %arg2: i32, %arg3: memref<4xf32, #tpu.memory_space<smem>>, %arg4: memref<1x4x2x128xf32, #tpu.memory_space<vmem>>, %arg5: memref<1x1x2x128xi32, #tpu.memory_space<vmem>>, %arg6: memref<1x1x14x128xf32, #tpu.memory_space<vmem>>, %arg7: memref<4x2x128xf32, #tpu.memory_space<vmem>>) attributes {dimension_semantics = [#tpu.dimension_semantics<parallel>, #tpu.dimension_semantics<parallel>, #tpu.dimension_semantics<arbitrary>], iteration_bounds = array<i64: 2, 1, 1>, scalar_prefetch = 1 : i64, scratch_operands = 1 : i64, tpu.core_type = #tpu.core_type<tc>, window_params = [{transform_indices = @transform_0, window_bounds = array<i64: 1, 4, 2, 128>}, {transform_indices = @transform_1, window_bounds = array<i64: 1, 1, 2, 128>}, {transform_indices = @transform_2, window_bounds = array<i64: 1, 1, 14, 128>}]} {
    %c0_i32 = arith.constant 0 : i32
    %0 = arith.cmpi eq, %arg2, %c0_i32 : i32
    %1 = arith.extui %0 : i1 to i32
    %c0_i32_0 = arith.constant 0 : i32
    %2 = arith.cmpi ne, %1, %c0_i32_0 : i32
    scf.if %2 {
      %cst_103 = arith.constant 0.000000e+00 : f32
      %181 = vector.broadcast %cst_103 : f32 to vector<1x1x14x128xf32>
      %c0_104 = arith.constant 0 : index
      %c0_105 = arith.constant 0 : index
      %c0_106 = arith.constant 0 : index
      %c0_107 = arith.constant 0 : index
      %182 = vector.load %arg6[%c0_104, %c0_105, %c0_106, %c0_107] : memref<1x1x14x128xf32, #tpu.memory_space<vmem>>, vector<1x1x14x128xf32>
      tpu.vector_store %arg6[%c0_104, %c0_105, %c0_106, %c0_107], %181 {strides = array<i32>} : memref<1x1x14x128xf32, #tpu.memory_space<vmem>>, vector<1x1x14x128xf32>,
    } else {
    }
    %c1_i32 = arith.constant 1 : i32
    %3 = arith.muli %arg1, %c1_i32 : i32
    %4 = arith.addi %3, %arg2 : i32
    %c2_i32 = arith.constant 2 : i32
    %5 = arith.muli %4, %c2_i32 : i32
    %6 = tpu.iota {dimensions = array<i32: 0>} : vector<2x128xi32>
    %7 = vector.broadcast %5 : i32 to vector<2x128xi32>
    %8 = arith.addi %6, %7 : vector<2x128xi32>
    %c2_i32_1 = arith.constant 2 : i32
    %9 = vector.broadcast %c2_i32_1 : i32 to vector<2x128xi32>
    %10 = arith.cmpi slt, %8, %9 : vector<2x128xi32>
    %c0 = arith.constant 0 : index
    %c0_2 = arith.constant 0 : index
    %c0_3 = arith.constant 0 : index
    %c0_4 = arith.constant 0 : index
    %11 = vector.load %arg5[%c0, %c0_2, %c0_3, %c0_4] : memref<1x1x2x128xi32, #tpu.memory_space<vmem>>, vector<1x1x2x128xi32>
    %12 = vector.shape_cast %11 : vector<1x1x2x128xi32> to vector<2x128xi32>
    %c-1_i32 = arith.constant -1 : i32
    %13 = vector.broadcast %c-1_i32 : i32 to vector<2x128xi32>
    %14 = arith.select %10, %12, %13 : vector<2x128xi1>, vector<2x128xi32>
    %c0_i32_5 = arith.constant 0 : i32
    %15 = vector.broadcast %c0_i32_5 : i32 to vector<2x128xi32>
    %16 = arith.cmpi sge, %14, %15 : vector<2x128xi32>
    %c0_6 = arith.constant 0 : index
    %c0_7 = arith.constant 0 : index
    %c0_8 = arith.constant 0 : index
    %c0_9 = arith.constant 0 : index
    %17 = vector.load %arg4[%c0_6, %c0_7, %c0_8, %c0_9] : memref<1x4x2x128xf32, #tpu.memory_space<vmem>>, vector<1x1x2x128xf32>
    %18 = vector.shape_cast %17 : vector<1x1x2x128xf32> to vector<2x128xf32>
    %c0_10 = arith.constant 0 : index
    %c1 = arith.constant 1 : index
    %c0_11 = arith.constant 0 : index
    %c0_12 = arith.constant 0 : index
    %19 = vector.load %arg4[%c0_10, %c1, %c0_11, %c0_12] : memref<1x4x2x128xf32, #tpu.memory_space<vmem>>, vector<1x1x2x128xf32>
    %20 = vector.shape_cast %19 : vector<1x1x2x128xf32> to vector<2x128xf32>
    %21 = arith.maximumf %18, %20 : vector<2x128xf32>
    %c0_13 = arith.constant 0 : index
    %c2 = arith.constant 2 : index
    %c0_14 = arith.constant 0 : index
    %c0_15 = arith.constant 0 : index
    %22 = vector.load %arg4[%c0_13, %c2, %c0_14, %c0_15] : memref<1x4x2x128xf32, #tpu.memory_space<vmem>>, vector<1x1x2x128xf32>
    %23 = vector.shape_cast %22 : vector<1x1x2x128xf32> to vector<2x128xf32>
    %24 = arith.maximumf %21, %23 : vector<2x128xf32>
    %c0_16 = arith.constant 0 : index
    %c3 = arith.constant 3 : index
    %c0_17 = arith.constant 0 : index
    %c0_18 = arith.constant 0 : index
    %25 = vector.load %arg4[%c0_16, %c3, %c0_17, %c0_18] : memref<1x4x2x128xf32, #tpu.memory_space<vmem>>, vector<1x1x2x128xf32>
    %26 = vector.shape_cast %25 : vector<1x1x2x128xf32> to vector<2x128xf32>
    %27 = arith.maximumf %24, %26 : vector<2x128xf32>
    %cst = arith.constant 0.000000e+00 : f32
    %28 = vector.broadcast %cst : f32 to vector<2x128xf32>
    %c0_19 = arith.constant 0 : index
    %c0_20 = arith.constant 0 : index
    %c0_21 = arith.constant 0 : index
    %c0_22 = arith.constant 0 : index
    %29 = vector.load %arg4[%c0_19, %c0_20, %c0_21, %c0_22] : memref<1x4x2x128xf32, #tpu.memory_space<vmem>>, vector<1x1x2x128xf32>
    %30 = vector.shape_cast %29 : vector<1x1x2x128xf32> to vector<2x128xf32>
    %c0_i32_23 = arith.constant 0 : i32
    %31 = vector.broadcast %c0_i32_23 : i32 to vector<2x128xi32>
    %32 = arith.cmpi eq, %14, %31 : vector<2x128xi32>
    %33 = arith.select %32, %30, %28 : vector<2x128xi1>, vector<2x128xf32>
    %c0_24 = arith.constant 0 : index
    %34 = memref.load %arg3[%c0_24] : memref<4xf32, #tpu.memory_space<smem>>
    %35 = vector.broadcast %34 : f32 to vector<2x128xf32>
    %36 = arith.select %32, %35, %28 : vector<2x128xi1>, vector<2x128xf32>
    %37 = arith.extui %32 : vector<2x128xi1> to vector<2x128xi32>
    %38 = arith.sitofp %37 : vector<2x128xi32> to vector<2x128xf32>
    %cst_25 = arith.constant dense<0.000000e+00> : vector<128xf32>
    %39 = vector.multi_reduction <add>, %38, %cst_25 [0] : vector<2x128xf32> to vector<128xf32>
    %40 = vector.shape_cast %39 : vector<128xf32> to vector<1x128xf32>
    %41 = arith.subf %30, %27 : vector<2x128xf32>
    %42 = math.exp %41 : vector<2x128xf32>
    %cst_26 = arith.constant 0.000000e+00 : f32
    %43 = vector.broadcast %cst_26 : f32 to vector<2x128xf32>
    %44 = arith.select %16, %42, %43 : vector<2x128xi1>, vector<2x128xf32>
    %45 = arith.addf %28, %44 : vector<2x128xf32>
    %c0_27 = arith.constant 0 : index
    %c0_28 = arith.constant 0 : index
    %c0_29 = arith.constant 0 : index
    %46 = vector.load %arg7[%c0_27, %c0_28, %c0_29] : memref<4x2x128xf32, #tpu.memory_space<vmem>>, vector<1x2x128xf32>
    %47 = vector.shape_cast %46 : vector<1x2x128xf32> to vector<2x128xf32>
    %48 = vector.shape_cast %44 : vector<2x128xf32> to vector<1x2x128xf32>
    tpu.vector_store %arg7[%c0_27, %c0_28, %c0_29], %48 {strides = array<i32>} : memref<4x2x128xf32, #tpu.memory_space<vmem>>, vector<1x2x128xf32>,
    %c0_30 = arith.constant 0 : index
    %c1_31 = arith.constant 1 : index
    %c0_32 = arith.constant 0 : index
    %c0_33 = arith.constant 0 : index
    %49 = vector.load %arg4[%c0_30, %c1_31, %c0_32, %c0_33] : memref<1x4x2x128xf32, #tpu.memory_space<vmem>>, vector<1x1x2x128xf32>
    %50 = vector.shape_cast %49 : vector<1x1x2x128xf32> to vector<2x128xf32>
    %c1_i32_34 = arith.constant 1 : i32
    %51 = vector.broadcast %c1_i32_34 : i32 to vector<2x128xi32>
    %52 = arith.cmpi eq, %14, %51 : vector<2x128xi32>
    %53 = arith.select %52, %50, %33 : vector<2x128xi1>, vector<2x128xf32>
    %c1_35 = arith.constant 1 : index
    %54 = memref.load %arg3[%c1_35] : memref<4xf32, #tpu.memory_space<smem>>
    %55 = vector.broadcast %54 : f32 to vector<2x128xf32>
    %56 = arith.select %52, %55, %36 : vector<2x128xi1>, vector<2x128xf32>
    %57 = arith.extui %52 : vector<2x128xi1> to vector<2x128xi32>
    %58 = arith.sitofp %57 : vector<2x128xi32> to vector<2x128xf32>
    %cst_36 = arith.constant dense<0.000000e+00> : vector<128xf32>
    %59 = vector.multi_reduction <add>, %58, %cst_36 [0] : vector<2x128xf32> to vector<128xf32>
    %60 = vector.shape_cast %59 : vector<128xf32> to vector<1x128xf32>
    %61 = arith.subf %50, %27 : vector<2x128xf32>
    %62 = math.exp %61 : vector<2x128xf32>
    %cst_37 = arith.constant 0.000000e+00 : f32
    %63 = vector.broadcast %cst_37 : f32 to vector<2x128xf32>
    %64 = arith.select %16, %62, %63 : vector<2x128xi1>, vector<2x128xf32>
    %65 = arith.addf %45, %64 : vector<2x128xf32>
    %c1_38 = arith.constant 1 : index
    %c0_39 = arith.constant 0 : index
    %c0_40 = arith.constant 0 : index
    %66 = vector.load %arg7[%c1_38, %c0_39, %c0_40] : memref<4x2x128xf32, #tpu.memory_space<vmem>>, vector<1x2x128xf32>
    %67 = vector.shape_cast %66 : vector<1x2x128xf32> to vector<2x128xf32>
    %68 = vector.shape_cast %64 : vector<2x128xf32> to vector<1x2x128xf32>
    tpu.vector_store %arg7[%c1_38, %c0_39, %c0_40], %68 {strides = array<i32>} : memref<4x2x128xf32, #tpu.memory_space<vmem>>, vector<1x2x128xf32>,
    %c0_41 = arith.constant 0 : index
    %c2_42 = arith.constant 2 : index
    %c0_43 = arith.constant 0 : index
    %c0_44 = arith.constant 0 : index
    %69 = vector.load %arg4[%c0_41, %c2_42, %c0_43, %c0_44] : memref<1x4x2x128xf32, #tpu.memory_space<vmem>>, vector<1x1x2x128xf32>
    %70 = vector.shape_cast %69 : vector<1x1x2x128xf32> to vector<2x128xf32>
    %c2_i32_45 = arith.constant 2 : i32
    %71 = vector.broadcast %c2_i32_45 : i32 to vector<2x128xi32>
    %72 = arith.cmpi eq, %14, %71 : vector<2x128xi32>
    %73 = arith.select %72, %70, %53 : vector<2x128xi1>, vector<2x128xf32>
    %c2_46 = arith.constant 2 : index
    %74 = memref.load %arg3[%c2_46] : memref<4xf32, #tpu.memory_space<smem>>
    %75 = vector.broadcast %74 : f32 to vector<2x128xf32>
    %76 = arith.select %72, %75, %56 : vector<2x128xi1>, vector<2x128xf32>
    %77 = arith.extui %72 : vector<2x128xi1> to vector<2x128xi32>
    %78 = arith.sitofp %77 : vector<2x128xi32> to vector<2x128xf32>
    %cst_47 = arith.constant dense<0.000000e+00> : vector<128xf32>
    %79 = vector.multi_reduction <add>, %78, %cst_47 [0] : vector<2x128xf32> to vector<128xf32>
    %80 = vector.shape_cast %79 : vector<128xf32> to vector<1x128xf32>
    %81 = arith.subf %70, %27 : vector<2x128xf32>
    %82 = math.exp %81 : vector<2x128xf32>
    %cst_48 = arith.constant 0.000000e+00 : f32
    %83 = vector.broadcast %cst_48 : f32 to vector<2x128xf32>
    %84 = arith.select %16, %82, %83 : vector<2x128xi1>, vector<2x128xf32>
    %85 = arith.addf %65, %84 : vector<2x128xf32>
    %c2_49 = arith.constant 2 : index
    %c0_50 = arith.constant 0 : index
    %c0_51 = arith.constant 0 : index
    %86 = vector.load %arg7[%c2_49, %c0_50, %c0_51] : memref<4x2x128xf32, #tpu.memory_space<vmem>>, vector<1x2x128xf32>
    %87 = vector.shape_cast %86 : vector<1x2x128xf32> to vector<2x128xf32>
    %88 = vector.shape_cast %84 : vector<2x128xf32> to vector<1x2x128xf32>
    tpu.vector_store %arg7[%c2_49, %c0_50, %c0_51], %88 {strides = array<i32>} : memref<4x2x128xf32, #tpu.memory_space<vmem>>, vector<1x2x128xf32>,
    %c0_52 = arith.constant 0 : index
    %c3_53 = arith.constant 3 : index
    %c0_54 = arith.constant 0 : index
    %c0_55 = arith.constant 0 : index
    %89 = vector.load %arg4[%c0_52, %c3_53, %c0_54, %c0_55] : memref<1x4x2x128xf32, #tpu.memory_space<vmem>>, vector<1x1x2x128xf32>
    %90 = vector.shape_cast %89 : vector<1x1x2x128xf32> to vector<2x128xf32>
    %c3_i32 = arith.constant 3 : i32
    %91 = vector.broadcast %c3_i32 : i32 to vector<2x128xi32>
    %92 = arith.cmpi eq, %14, %91 : vector<2x128xi32>
    %93 = arith.select %92, %90, %73 : vector<2x128xi1>, vector<2x128xf32>
    %c3_56 = arith.constant 3 : index
    %94 = memref.load %arg3[%c3_56] : memref<4xf32, #tpu.memory_space<smem>>
    %95 = vector.broadcast %94 : f32 to vector<2x128xf32>
    %96 = arith.select %92, %95, %76 : vector<2x128xi1>, vector<2x128xf32>
    %97 = arith.extui %92 : vector<2x128xi1> to vector<2x128xi32>
    %98 = arith.sitofp %97 : vector<2x128xi32> to vector<2x128xf32>
    %cst_57 = arith.constant dense<0.000000e+00> : vector<128xf32>
    %99 = vector.multi_reduction <add>, %98, %cst_57 [0] : vector<2x128xf32> to vector<128xf32>
    %100 = vector.shape_cast %99 : vector<128xf32> to vector<1x128xf32>
    %101 = arith.subf %90, %27 : vector<2x128xf32>
    %102 = math.exp %101 : vector<2x128xf32>
    %cst_58 = arith.constant 0.000000e+00 : f32
    %103 = vector.broadcast %cst_58 : f32 to vector<2x128xf32>
    %104 = arith.select %16, %102, %103 : vector<2x128xi1>, vector<2x128xf32>
    %105 = arith.addf %85, %104 : vector<2x128xf32>
    %c3_59 = arith.constant 3 : index
    %c0_60 = arith.constant 0 : index
    %c0_61 = arith.constant 0 : index
    %106 = vector.load %arg7[%c3_59, %c0_60, %c0_61] : memref<4x2x128xf32, #tpu.memory_space<vmem>>, vector<1x2x128xf32>
    %107 = vector.shape_cast %106 : vector<1x2x128xf32> to vector<2x128xf32>
    %108 = vector.shape_cast %104 : vector<2x128xf32> to vector<1x2x128xf32>
    tpu.vector_store %arg7[%c3_59, %c0_60, %c0_61], %108 {strides = array<i32>} : memref<4x2x128xf32, #tpu.memory_space<vmem>>, vector<1x2x128xf32>,
    %109 = math.log %105 : vector<2x128xf32>
    %110 = tpu.reciprocal %105 {approx = true} : vector<2x128xf32> -> vector<2x128xf32>
    %111 = arith.mulf %105, %110 : vector<2x128xf32>
    %cst_62 = arith.constant 2.000000e+00 : f32
    %112 = vector.broadcast %cst_62 : f32 to vector<2x128xf32>
    %113 = arith.subf %112, %111 : vector<2x128xf32>
    %114 = arith.mulf %110, %113 : vector<2x128xf32>
    %cst_63 = arith.constant 0.000000e+00 : f32
    %115 = vector.broadcast %cst_63 : f32 to vector<2x128xf32>
    %116 = arith.select %16, %114, %115 : vector<2x128xi1>, vector<2x128xf32>
    %117 = arith.addf %27, %109 : vector<2x128xf32>
    %118 = arith.subf %117, %93 : vector<2x128xf32>
    %cst_64 = arith.constant 0.000000e+00 : f32
    %119 = vector.broadcast %cst_64 : f32 to vector<2x128xf32>
    %120 = arith.select %16, %118, %119 : vector<2x128xi1>, vector<2x128xf32>
    %121 = arith.mulf %96, %120 : vector<2x128xf32>
    %cst_65 = arith.constant dense<0.000000e+00> : vector<128xf32>
    %122 = vector.multi_reduction <add>, %121, %cst_65 [0] : vector<2x128xf32> to vector<128xf32>
    %123 = vector.shape_cast %122 : vector<128xf32> to vector<1x128xf32>
    %cst_66 = arith.constant dense<0.000000e+00> : vector<128xf32>
    %124 = vector.multi_reduction <add>, %96, %cst_66 [0] : vector<2x128xf32> to vector<128xf32>
    %125 = vector.shape_cast %124 : vector<128xf32> to vector<1x128xf32>
    %c0_67 = arith.constant 0 : index
    %c0_68 = arith.constant 0 : index
    %c0_69 = arith.constant 0 : index
    %126 = vector.load %arg7[%c0_67, %c0_68, %c0_69] : memref<4x2x128xf32, #tpu.memory_space<vmem>>, vector<1x2x128xf32>
    %127 = vector.shape_cast %126 : vector<1x2x128xf32> to vector<2x128xf32>
    %c0_i32_70 = arith.constant 0 : i32
    %128 = vector.broadcast %c0_i32_70 : i32 to vector<2x128xi32>
    %129 = arith.cmpi eq, %14, %128 : vector<2x128xi32>
    %cst_71 = arith.constant 0.000000e+00 : f32
    %130 = vector.broadcast %cst_71 : f32 to vector<2x128xf32>
    %131 = arith.select %129, %114, %130 : vector<2x128xi1>, vector<2x128xf32>
    %132 = arith.mulf %127, %131 : vector<2x128xf32>
    %cst_72 = arith.constant dense<0.000000e+00> : vector<128xf32>
    %133 = vector.multi_reduction <add>, %132, %cst_72 [0] : vector<2x128xf32> to vector<128xf32>
    %134 = vector.shape_cast %133 : vector<128xf32> to vector<1x128xf32>
    %135 = arith.mulf %127, %116 : vector<2x128xf32>
    %cst_73 = arith.constant dense<0.000000e+00> : vector<128xf32>
    %136 = vector.multi_reduction <add>, %135, %cst_73 [0] : vector<2x128xf32> to vector<128xf32>
    %137 = vector.shape_cast %136 : vector<128xf32> to vector<1x128xf32>
    %c1_74 = arith.constant 1 : index
    %c0_75 = arith.constant 0 : index
    %c0_76 = arith.constant 0 : index
    %138 = vector.load %arg7[%c1_74, %c0_75, %c0_76] : memref<4x2x128xf32, #tpu.memory_space<vmem>>, vector<1x2x128xf32>
    %139 = vector.shape_cast %138 : vector<1x2x128xf32> to vector<2x128xf32>
    %c1_i32_77 = arith.constant 1 : i32
    %140 = vector.broadcast %c1_i32_77 : i32 to vector<2x128xi32>
    %141 = arith.cmpi eq, %14, %140 : vector<2x128xi32>
    %cst_78 = arith.constant 0.000000e+00 : f32
    %142 = vector.broadcast %cst_78 : f32 to vector<2x128xf32>
    %143 = arith.select %141, %114, %142 : vector<2x128xi1>, vector<2x128xf32>
    %144 = arith.mulf %139, %143 : vector<2x128xf32>
    %cst_79 = arith.constant dense<0.000000e+00> : vector<128xf32>
    %145 = vector.multi_reduction <add>, %144, %cst_79 [0] : vector<2x128xf32> to vector<128xf32>
    %146 = vector.shape_cast %145 : vector<128xf32> to vector<1x128xf32>
    %147 = arith.mulf %139, %116 : vector<2x128xf32>
    %cst_80 = arith.constant dense<0.000000e+00> : vector<128xf32>
    %148 = vector.multi_reduction <add>, %147, %cst_80 [0] : vector<2x128xf32> to vector<128xf32>
    %149 = vector.shape_cast %148 : vector<128xf32> to vector<1x128xf32>
    %c2_81 = arith.constant 2 : index
    %c0_82 = arith.constant 0 : index
    %c0_83 = arith.constant 0 : index
    %150 = vector.load %arg7[%c2_81, %c0_82, %c0_83] : memref<4x2x128xf32, #tpu.memory_space<vmem>>, vector<1x2x128xf32>
    %151 = vector.shape_cast %150 : vector<1x2x128xf32> to vector<2x128xf32>
    %c2_i32_84 = arith.constant 2 : i32
    %152 = vector.broadcast %c2_i32_84 : i32 to vector<2x128xi32>
    %153 = arith.cmpi eq, %14, %152 : vector<2x128xi32>
    %cst_85 = arith.constant 0.000000e+00 : f32
    %154 = vector.broadcast %cst_85 : f32 to vector<2x128xf32>
    %155 = arith.select %153, %114, %154 : vector<2x128xi1>, vector<2x128xf32>
    %156 = arith.mulf %151, %155 : vector<2x128xf32>
    %cst_86 = arith.constant dense<0.000000e+00> : vector<128xf32>
    %157 = vector.multi_reduction <add>, %156, %cst_86 [0] : vector<2x128xf32> to vector<128xf32>
    %158 = vector.shape_cast %157 : vector<128xf32> to vector<1x128xf32>
    %159 = arith.mulf %151, %116 : vector<2x128xf32>
    %cst_87 = arith.constant dense<0.000000e+00> : vector<128xf32>
    %160 = vector.multi_reduction <add>, %159, %cst_87 [0] : vector<2x128xf32> to vector<128xf32>
    %161 = vector.shape_cast %160 : vector<128xf32> to vector<1x128xf32>
    %c3_88 = arith.constant 3 : index
    %c0_89 = arith.constant 0 : index
    %c0_90 = arith.constant 0 : index
    %162 = vector.load %arg7[%c3_88, %c0_89, %c0_90] : memref<4x2x128xf32, #tpu.memory_space<vmem>>, vector<1x2x128xf32>
    %163 = vector.shape_cast %162 : vector<1x2x128xf32> to vector<2x128xf32>
    %c3_i32_91 = arith.constant 3 : i32
    %164 = vector.broadcast %c3_i32_91 : i32 to vector<2x128xi32>
    %165 = arith.cmpi eq, %14, %164 : vector<2x128xi32>
    %cst_92 = arith.constant 0.000000e+00 : f32
    %166 = vector.broadcast %cst_92 : f32 to vector<2x128xf32>
    %167 = arith.select %165, %114, %166 : vector<2x128xi1>, vector<2x128xf32>
    %168 = arith.mulf %163, %167 : vector<2x128xf32>
    %cst_93 = arith.constant dense<0.000000e+00> : vector<128xf32>
    %169 = vector.multi_reduction <add>, %168, %cst_93 [0] : vector<2x128xf32> to vector<128xf32>
    %170 = vector.shape_cast %169 : vector<128xf32> to vector<1x128xf32>
    %171 = arith.mulf %163, %116 : vector<2x128xf32>
    %cst_94 = arith.constant dense<0.000000e+00> : vector<128xf32>
    %172 = vector.multi_reduction <add>, %171, %cst_94 [0] : vector<2x128xf32> to vector<128xf32>
    %173 = vector.shape_cast %172 : vector<128xf32> to vector<1x128xf32>
    %174 = tpu.concatenate %123, %125, %134, %146, %158, %170, %137, %149, %161, %173, %40, %60, %80, %100 in 0 : vector<1x128xf32>, vector<1x128xf32>, vector<1x128xf32>, vector<1x128xf32>, vector<1x128xf32>, vector<1x128xf32>, vector<1x128xf32>, vector<1x128xf32>, vector<1x128xf32>, vector<1x128xf32>, vector<1x128xf32>, vector<1x128xf32>, vector<1x128xf32>, vector<1x128xf32> -> vector<14x128xf32>
    %c0_95 = arith.constant 0 : index
    %c0_96 = arith.constant 0 : index
    %c0_97 = arith.constant 0 : index
    %c0_98 = arith.constant 0 : index
    %175 = vector.load %arg6[%c0_95, %c0_96, %c0_97, %c0_98] : memref<1x1x14x128xf32, #tpu.memory_space<vmem>>, vector<1x1x14x128xf32>
    %176 = vector.shape_cast %175 : vector<1x1x14x128xf32> to vector<14x128xf32>
    %177 = arith.addf %176, %174 : vector<14x128xf32>
    %c0_99 = arith.constant 0 : index
    %c0_100 = arith.constant 0 : index
    %c0_101 = arith.constant 0 : index
    %c0_102 = arith.constant 0 : index
    %178 = vector.load %arg6[%c0_99, %c0_100, %c0_101, %c0_102] : memref<1x1x14x128xf32, #tpu.memory_space<vmem>>, vector<1x1x14x128xf32>
    %179 = vector.shape_cast %178 : vector<1x1x14x128xf32> to vector<14x128xf32>
    %180 = vector.shape_cast %177 : vector<14x128xf32> to vector<1x1x14x128xf32>
    tpu.vector_store %arg6[%c0_99, %c0_100, %c0_101, %c0_102], %180 {strides = array<i32>} : memref<1x1x14x128xf32, #tpu.memory_space<vmem>>, vector<1x1x14x128xf32>,
    return
  }
  func.func @transform_0(%arg0: i32, %arg1: i32, %arg2: i32, %arg3: memref<4xf32, #tpu.memory_space<smem>>) -> (i32, i32, i32, i32) {
    %c1_i32 = arith.constant 1 : i32
    %0 = arith.muli %arg1, %c1_i32 : i32
    %1 = arith.addi %0, %arg2 : i32
    %c0_i32 = arith.constant 0 : i32
    %c0_i32_0 = arith.constant 0 : i32
    %c0_i32_1 = arith.constant 0 : i32
    return %arg0, %c0_i32, %1, %c0_i32_0 : i32, i32, i32, i32
  }
  func.func @transform_1(%arg0: i32, %arg1: i32, %arg2: i32, %arg3: memref<4xf32, #tpu.memory_space<smem>>) -> (i32, i32, i32, i32) {
    %c1_i32 = arith.constant 1 : i32
    %0 = arith.muli %arg1, %c1_i32 : i32
    %1 = arith.addi %0, %arg2 : i32
    %c0_i32 = arith.constant 0 : i32
    %c0_i32_0 = arith.constant 0 : i32
    %c0_i32_1 = arith.constant 0 : i32
    return %arg0, %c0_i32, %1, %c0_i32_0 : i32, i32, i32, i32
  }
  func.func @transform_2(%arg0: i32, %arg1: i32, %arg2: i32, %arg3: memref<4xf32, #tpu.memory_space<smem>>) -> (i32, i32, i32, i32) {
    %c0_i32 = arith.constant 0 : i32
    %c0_i32_0 = arith.constant 0 : i32
    %c0_i32_1 = arith.constant 0 : i32
    return %arg0, %arg1, %c0_i32, %c0_i32_0 : i32, i32, i32, i32
  }
}

</mosaic_0001>

<bundles_post_ra>
// kernel: combined_loss.1
= control target key start
LH: loop header
LB: loop body
LE: loop exit
PB: predicated region body
PF: predicated region fallthrough
CT: control target
= control target key end

     0   :  { %s873_s0 = inlined_call_operand.vmem [shape: f32[4], index: 0, kind: input, shape index: {}]   ;;  %s874_s1 = inlined_call_operand.vmem [shape: f32[2,4,2,128], index: 1, kind: input, shape index: {}]   ;;  %s875_s2 = inlined_call_operand.vmem [shape: s32[2,1,2,128], index: 2, kind: input, shape index: {}]   ;;  %s876_s3 = inlined_call_operand.vmem [shape: f32[2,1,14,128], index: 3, kind: output, shape index: {}]  }
   0x1   :  { %s8_s14 = sshll.u32 %s873_s0, 4  ;;  %s9_s14 = int_to_ptr.vmem [resolvable:$true] %s8_s14 }
   0x2   :  { %s639_s15 = scalar_lea.vmem %s9_s14, 16  ;;  %p644_p1 = scmp.lt.s32.totalorder %s9_s14, %s9_s14 }
   0x3   :  { %p640_p0 = scmp.ne.s32.totalorder %s9_s14, %s639_s15  ;;  %p645_p2 = scmp.lt.s32.totalorder %s639_s15, %s639_s15 }
   0x5   :  { %p646_p3 = por %p645_p2, %p644_p1 }
   0x7   :  { %p647_p4 = pnand %p646_p3, %p640_p0 }
   0x9   :  { %650 = shalt.err (!%p647_p4)  }
   0xa   :  { %s677_s16 = smov [#allocation4]  }
   0xb   :  { %11 = dma.vmem_to_smem %s9_s14, 16, %s677_s16, [#allocation3] }
   0xc   :  { %663 = dma.done.wait [#allocation3], 16 }
   0xd   :  { %664 = vsyncadd [#allocation3], 4294967280 }
   0xe   :  { %13 = sfence }
   0xf   :  { %s702_s17 = smov 0   ;;  %s704_s18 = smov 0  }
  0x10   :  { %s706_s19 = smov 0  }
  0x11 LB: > { %s38_s0 = sadd.s32 1, %s671_s18  ;;  %p578_p5 = scmp.ge.s32.totalorder %s675_s19, 1  ;;  %s675_s19 = sphi %s706_s19, %s19_s19   ;;  %s671_s18 = sphi %s704_s18, %s878_s18   ;;  %s667_s17 = sphi %s702_s17, %s877_s17  }
  0x12   : > { %p40_p6 = scmp.ge.s32.totalorder %s38_s0, 2  ;;  %p167_p7 = scmp.lt.s32.totalorder %s675_s19, 3 }
  0x14   : > { %s880_s0 = smov (%p40_p6, %s38_s0), 0  ;;  %p168_p8 = pnand %p578_p5, %p167_p7 }
  0x15   : > { %p206_p9 = scmp.lt.s32.totalorder (!%p168_p8), %s667_s17, 1  ;;  %s261_s5 = sld [smem:[#allocation4]] (!%p168_p8) }
  0x16   : > { %171 = sbr.rel (%p168_p8) target bundleno = 117 (0x75), region = 28  ;;  %s589_s6 = sld [smem:[#allocation4 + $0x1]] (!%p168_p8) }
  0x17   : > { %s760_s7 = sld [smem:[#allocation4 + $0x2]] (!%p168_p8) }
  0x18   : > { %s595_s8 = sld [smem:[#allocation4 + $0x3]] (!%p168_p8) }
  0x1b   : > { %s882_s17 = smov (!%p206_p9, %s667_s17), 1  ;;  %v678_v6 = vmov 0.0   ;;  %v241_v15 = vlaneseq  ;;  %v262_v24 = vstv %s261_s5  ;;  %vm266_vm3 = vcmask 1041408  }
  0x1c   : > { %s599_s20 = sshll.u32 %s882_s17, 3  ;;  %s600_s24 = sshll.u32 %s882_s17, 4  ;;  %v284_v34 = vstv %s589_s6  ;;  %vm443_vm7 = vcmask 1040384   ;;  %vm446_vm8 = vcmask 1042432   ;;  %vm448_vm9 = vcmask 1043456  }
  0x1d   : > { %s213_s23 = scalar_lea.vmem %s874_s1, %s599_s20  ;;  %s733_s27 = scalar_lea.vmem %s876_s3, %s600_s24  ;;  %v242_v20 = vshrl.u32 %v241_v15, 7  ;;  %v306_v39 = vstv %s760_s7  ;;  %vm450_vm10 = vcmask 1044480   ;;  %vm452_vm11 = vcmask 1045504  }
  0x1e   : > { %v726_v0 = vld [vmem:[%s213_s23] sm:$0x3]  ;;  %v584_v1 = vld [vmem:[%s213_s23 + $0x2] sm:$0x3]  ;;  %v585_v3 = vld [vmem:[%s213_s23 + $0x4] sm:$0x3]  ;;  %v328_v45 = vstv %s595_s8 }
  0x1f   : > { %v252_v2 = vmax.f32 %v726_v0, %v584_v1  ;;  %v586_v4 = vld [vmem:[%s213_s23 + $0x6] sm:$0x3]  ;;  %238 = vst [vmem:[%s733_s27 + $0x8] sm:$0x3f] %v678_v6  ;;  %v737_v7 = vld [vmem:[%s213_s23 + $0x2] sm:$0x3] }
  0x20   : > { %v739_v8 = vld [vmem:[%s213_s23 + $0x4] sm:$0x3]  ;;  %v741_v9 = vld [vmem:[%s213_s23 + $0x6] sm:$0x3]  ;;  %s581_s28 = sshll.u32 %s882_s17, 1  ;;  %vm245_vm0 = vcmp.lt.s32.totalorder %v242_v20, 2 }
  0x21   : > { %v255_v5 = vmax.f32 %v252_v2, %v585_v3  ;;  %s222_s4 = scalar_lea.vmem %s875_s2, %s581_s28  ;;  %vm454_vm12 = vcmask 1046528  }
  0x22   : > { %v246_v21 = vld [vmem:[%s222_s4] sm:$0x3] }
  0x23   : > { %v743_v10 = vmax.f32 %v255_v5, %v586_v4  ;;  %v757_v22 = vsel %vm245_vm0, %v246_v21, 4294967295 }
  0x24   : > { %vm248_vm1 = vcmp.ge.s32.totalorder %v757_v22, 0  ;;  %vm259_vm2 = vcmp.eq.s32.totalorder %v757_v22, 0  ;;  %vm281_vm4 = vcmp.eq.s32.totalorder %v757_v22, 1  ;;  %vm303_vm5 = vcmp.eq.s32.totalorder %v757_v22, 2 }
  0x25   : > { %v274_v11 = vsub.f32 %v726_v0, %v743_v10  ;;  %v295_v12 = vsub.f32 %v737_v7, %v743_v10  ;;  %v317_v13 = vsub.f32 %v739_v8, %v743_v10  ;;  %v339_v14 = vsub.f32 %v741_v9, %v743_v10 }
  0x26   : > { %v587_v29 = vsel %vm259_vm2, 1.0, %v678_v6  ;;  %v263_v33 = vsel %vm259_vm2, %v262_v24, 0.0  ;;  %v590_v41 = vsel %vm281_vm4, 1.0, %v678_v6  ;;  %v593_v42 = vsel %vm303_vm5, 1.0, %v678_v6 }
  0x27   : > { %v275_v16 = vmul.f32 1.442695, %v274_v11  ;;  %v296_v17 = vmul.f32 1.442695, %v295_v12  ;;  %v318_v18 = vmul.f32 1.442695, %v317_v13  ;;  %v285_v38 = vsel %vm281_vm4, %v284_v34, %v263_v33 }
  0x28   : > { %v340_v19 = vmul.f32 1.442695, %v339_v14  ;;  %v267_v37 = vsel %vm266_vm3, %v587_v29, 0.0  ;;  %v307_v44 = vsel %vm303_vm5, %v306_v39, %v285_v38  ;;  %v288_v46 = vsel %vm266_vm3, %v590_v41, 0.0 }
  0x29   : > { %627 = vpow2.f32 %v275_v16  ;;  %v268_v43 = vrot.slane %v267_v37, 4  ;;  %v310_v47 = vsel %vm266_vm3, %v593_v42, 0.0  ;;  %vm325_vm6 = vcmp.eq.s32.totalorder %v757_v22, 3 }
  0x2a   : > { %629 = vpow2.f32 %v296_v17  ;;  %v329_v49 = vsel %vm325_vm6, %v328_v45, %v307_v44  ;;  %v289_v50 = vrot.slane %v288_v46, 4  ;;  %v311_v51 = vrot.slane %v310_v47, 4 }
  0x2b   : > { %631 = vpow2.f32 %v318_v18  ;;  %v269_v48 = vadd.f32 %v268_v43, %v267_v37  ;;  %v596_v52 = vsel %vm325_vm6, 1.0, %v678_v6  ;;  %v364_v53 = vsel %vm266_vm3, %v329_v49, 0.0 }
  0x2c   : > { %633 = vpow2.f32 %v340_v19  ;;  %v260_v54 = vsel %vm259_vm2, %v726_v0, 0.0  ;;  %v332_v56 = vsel %vm266_vm3, %v596_v52, 0.0  ;;  %v365_v57 = vrot.slane %v364_v53, 4 }
  0x2d   : > { %v270_v55 = vrot.slane %v269_v48, 2  ;;  %v290_v58 = vadd.f32 %v289_v50, %v288_v46  ;;  %v312_v59 = vadd.f32 %v311_v51, %v310_v47  ;;  %v282_v60 = vsel %vm281_vm4, %v737_v7, %v260_v54 }
  0x2e   : > { %v333_v61 = vrot.slane %v332_v56, 4  ;;  %v304_v63 = vsel %vm303_vm5, %v739_v8, %v282_v60  ;;  %v366_v1 = vadd.f32 %v365_v57, %v364_v53 }
  0x2f   : > { %v271_v62 = vadd.f32 %v270_v55, %v269_v48  ;;  %v291_v2 = vrot.slane %v290_v58, 2  ;;  %v313_v3 = vrot.slane %v312_v59, 2  ;;  %v326_v11 = vsel %vm325_vm6, %v741_v9, %v304_v63 }
  0x30   : > { %v334_v6 = vadd.f32 %v333_v61, %v332_v56  ;;  %v367_v14 = vrot.slane %v366_v1, 2 }
  0x31   : > { %v272_v13 = vrot.slane %v271_v62, 1  ;;  %v813_v15 = vadd.f32 %v291_v2, %v290_v58  ;;  %v815_v16 = vadd.f32 %v313_v3, %v312_v59 }
  0x32   : > { %v335_v18 = vrot.slane %v334_v6, 2  ;;  %v368_v24 = vadd.f32 %v367_v14, %v366_v1 }
  0x36   : > { %v628_v23 = vpop.eup %627 }
  0x37   : > { %v630_v25 = vpop.eup %629  ;;  %v277_v26 = vsel %vm248_vm1, %v628_v23, 0.0  ;;  %v819_v23 = vadd.f32 %v272_v13, %v271_v62 }
  0x38   : > { %v632_v27 = vpop.eup %631  ;;  %279 = vst [vmem:[#allocation2] sm:$0x3] %v277_v26  ;;  %v298_v28 = vsel %vm248_vm1, %v630_v25, 0.0  ;;  %v315_v25 = vrot.slane %v815_v16, 1 }
  0x39   : > { %v634_v30 = vpop.eup %633  ;;  %v299_v31 = vadd.f32 %v298_v28, %v277_v26  ;;  %301 = vst [vmem:[#allocation2 + $0x2] sm:$0x3] %v298_v28  ;;  %v320_v32 = vsel %vm248_vm1, %v632_v27, 0.0 }
  0x3a   : > { %323 = vst [vmem:[#allocation2 + $0x4] sm:$0x3] %v320_v32  ;;  %v342_v35 = vsel %vm248_vm1, %v634_v30, 0.0  ;;  %v316_v22 = vadd.f32 %v315_v25, %v815_v16  ;;  %v462_v16 = vld [vmem:[%s733_s27 + $0x8] sm:$0x3f] }
  0x3b   : > { %v321_v36 = vadd.f32 %v320_v32, %v299_v31  ;;  %345 = vst [vmem:[#allocation2 + $0x6] sm:$0x3] %v342_v35 }
  0x3d   : > { %v343_v40 = vadd.f32 %v342_v35, %v321_v36  ;;  %v336_v35 = vadd.f32 %v335_v18, %v334_v6 }
  0x3f   : > { %635 = vlog2.f32 %v343_v40  ;;  %v371_v26 = vld [vmem:[#allocation2] sm:$0x3]  ;;  %v337_v2 = vrot.slane %v336_v35, 1 }
  0x40   : > { %637 = vrcp.f32 %v343_v40  ;;  %v389_v31 = vld [vmem:[#allocation2 + $0x2] sm:$0x3] }
  0x41   : > { %v407_v20 = vld [vmem:[#allocation2 + $0x4] sm:$0x3] }
  0x42   : > { %v817_v21 = vld [vmem:[#allocation2 + $0x6] sm:$0x3] }
  0x4c   : > { %v636_v0 = vpop.eup %635 }
  0x4d   : > { %v638_v4 = vpop.eup %637  ;;  %v347_v5 = vmul.f32 0.6931472, %v636_v0 }
  0x4e   : > { %v349_v12 = vmul.f32 %v638_v4, %v343_v40 }
  0x4f   : > { %v353_v7 = vadd.f32 %v347_v5, %v743_v10  ;;  %v293_v10 = vrot.slane %v813_v15, 1 }
  0x50   : > { %v350_v8 = vsub.f32 2.0, %v349_v12 }
  0x51   : > { %v354_v17 = vsub.f32 %v353_v7, %v326_v11 }
  0x52   : > { %v351_v19 = vmul.f32 %v638_v4, %v350_v8 }
  0x53   : > { %v355_v9 = vsel %vm248_vm1, %v354_v17, 0.0 }
  0x54   : > { %v352_v27 = vsel %vm248_vm1, %v351_v19, 0.0  ;;  %v356_v28 = vmul.f32 %v355_v9, %v329_v49  ;;  %v372_v29 = vsel %vm259_vm2, %v351_v19, 0.0  ;;  %v408_v30 = vsel %vm303_vm5, %v351_v19, 0.0 }
  0x55   : > { %v409_v32 = vmul.f32 %v408_v30, %v407_v20  ;;  %v417_v33 = vmul.f32 %v407_v20, %v352_v27  ;;  %v435_v34 = vmul.f32 %v817_v21, %v352_v27  ;;  %v373_v37 = vmul.f32 %v372_v29, %v371_v26 }
  0x56   : > { %v357_v36 = vsel %vm266_vm3, %v356_v28, 0.0  ;;  %v381_v38 = vmul.f32 %v371_v26, %v352_v27  ;;  %v390_v39 = vsel %vm281_vm4, %v351_v19, 0.0  ;;  %v369_v49 = vrot.slane %v368_v24, 1 }
  0x57   : > { %v358_v40 = vrot.slane %v357_v36, 4  ;;  %v418_v41 = vsel %vm266_vm3, %v417_v33, 0.0  ;;  %v436_v42 = vsel %vm266_vm3, %v435_v34, 0.0  ;;  %v391_v43 = vmul.f32 %v390_v39, %v389_v31 }
  0x58   : > { %v419_v44 = vrot.slane %v418_v41, 4  ;;  %v437_v45 = vrot.slane %v436_v42, 4  ;;  %v374_v46 = vsel %vm266_vm3, %v373_v37, 0.0  ;;  %v382_v47 = vsel %vm266_vm3, %v381_v38, 0.0 }
  0x59   : > { %v359_v48 = vadd.f32 %v358_v40, %v357_v36  ;;  %v375_v50 = vrot.slane %v374_v46, 4  ;;  %v392_v51 = vsel %vm266_vm3, %v391_v43, 0.0  ;;  %v399_v55 = vmul.f32 %v389_v31, %v352_v27 }
  0x5a   : > { %v420_v52 = vadd.f32 %v419_v44, %v418_v41  ;;  %v438_v53 = vadd.f32 %v437_v45, %v436_v42  ;;  %v393_v54 = vrot.slane %v392_v51, 4  ;;  %v383_v58 = vrot.slane %v382_v47, 4 }
  0x5b   : > { %v360_v56 = vrot.slane %v359_v48, 2  ;;  %v376_v57 = vadd.f32 %v375_v50, %v374_v46  ;;  %v410_v59 = vsel %vm266_vm3, %v409_v32, 0.0  ;;  %v400_v63 = vsel %vm266_vm3, %v399_v55, 0.0 }
  0x5c   : > { %v421_v60 = vrot.slane %v420_v52, 2  ;;  %v439_v61 = vrot.slane %v438_v53, 2  ;;  %v394_v62 = vadd.f32 %v393_v54, %v392_v51  ;;  %v401_v0 = vrot.slane %v400_v63, 4 }
  0x5d   : > { %v361_v1 = vadd.f32 %v360_v56, %v359_v48  ;;  %v377_v3 = vrot.slane %v376_v57, 2  ;;  %v411_v11 = vrot.slane %v410_v59, 4  ;;  %v426_v13 = vsel %vm325_vm6, %v351_v19, 0.0 }
  0x5e   : > { %v422_v4 = vadd.f32 %v421_v60, %v420_v52  ;;  %v440_v5 = vadd.f32 %v439_v61, %v438_v53  ;;  %v395_v6 = vrot.slane %v394_v62, 2  ;;  %v384_v14 = vadd.f32 %v383_v58, %v382_v47 }
  0x5f   : > { %v362_v12 = vrot.slane %v361_v1, 1  ;;  %v378_v7 = vadd.f32 %v377_v3, %v376_v57  ;;  %v402_v18 = vadd.f32 %v401_v0, %v400_v63  ;;  %v412_v20 = vadd.f32 %v411_v11, %v410_v59 }
  0x60   : > { %v423_v8 = vrot.slane %v422_v4, 1  ;;  %v441_v17 = vrot.slane %v440_v5, 1  ;;  %v294_v9 = vadd.f32 %v293_v10, %v813_v15  ;;  %v370_v26 = vadd.f32 %v369_v49, %v368_v24 }
  0x61   : > { %v379_v27 = vrot.slane %v378_v7, 1  ;;  %v396_v28 = vadd.f32 %v395_v6, %v394_v62  ;;  %v363_v31 = vadd.f32 %v362_v12, %v361_v1  ;;  %v413_v32 = vrot.slane %v412_v20, 2 }
  0x62   : > { %v424_v29 = vadd.f32 %v423_v8, %v422_v4  ;;  %v442_v30 = vadd.f32 %v441_v17, %v440_v5  ;;  %v427_v19 = vmul.f32 %v426_v13, %v817_v21  ;;  %v338_v33 = vadd.f32 %v337_v2, %v336_v35 }
  0x63   : > { %v385_v15 = vrot.slane %v384_v14, 2  ;;  %v403_v24 = vrot.slane %v402_v18, 2  ;;  %v380_v36 = vadd.f32 %v379_v27, %v378_v7  ;;  %v414_v37 = vadd.f32 %v413_v32, %v412_v20 }
  0x64   : > { %v456_v34 = vsel %vm443_vm7, %v424_v29, %v442_v30  ;;  %v428_v38 = vsel %vm266_vm3, %v427_v19, 0.0  ;;  %v397_v25 = vrot.slane %v396_v28, 1  ;;  %v444_v21 = vsel %vm443_vm7, %v363_v31, %v370_v26 }
  0x65   : > { %v457_v10 = vsel %vm266_vm3, %v456_v34, %v819_v23  ;;  %v429_v40 = vrot.slane %v428_v38, 4  ;;  %v386_v44 = vadd.f32 %v385_v15, %v384_v14  ;;  %v415_v23 = vrot.slane %v414_v37, 1 }
  0x66   : > { %v458_v39 = vsel %vm446_vm8, %v457_v10, %v294_v9  ;;  %v445_v45 = vsel %vm266_vm3, %v444_v21, %v380_v36  ;;  %v398_v46 = vadd.f32 %v397_v25, %v396_v28  ;;  %v404_v47 = vadd.f32 %v403_v24, %v402_v18 }
  0x67   : > { %v459_v35 = vsel %vm448_vm9, %v458_v39, %v316_v22  ;;  %v430_v42 = vadd.f32 %v429_v40, %v428_v38  ;;  %v387_v51 = vrot.slane %v386_v44, 1  ;;  %v416_v52 = vadd.f32 %v415_v23, %v414_v37 }
  0x68   : > { %v460_v41 = vsel %vm450_vm10, %v459_v35, %v338_v33  ;;  %v447_v50 = vsel %vm446_vm8, %v445_v45, %v398_v46  ;;  %v405_v53 = vrot.slane %v404_v47, 1 }
  0x69   : > { %v464_v43 = vadd.f32 %v462_v16, %v460_v41  ;;  %v431_v48 = vrot.slane %v430_v42, 2  ;;  %v449_v55 = vsel %vm448_vm9, %v447_v50, %v416_v52  ;;  %v388_v57 = vadd.f32 %v387_v51, %v386_v44 }
  0x6a   : > { %v406_v58 = vadd.f32 %v405_v53, %v404_v47 }
  0x6b   : > { %466 = vst [vmem:[%s733_s27 + $0x8] sm:$0x3f] %v464_v43  ;;  %v432_v49 = vadd.f32 %v431_v48, %v430_v42 }
  0x6d   : > { %v433_v54 = vrot.slane %v432_v49, 1 }
  0x6f   : > { %v434_v56 = vadd.f32 %v433_v54, %v432_v49 }
  0x71   : > { %v451_v59 = vsel %vm450_vm10, %v449_v55, %v434_v56 }
  0x72   : > { %v453_v60 = vsel %vm452_vm11, %v451_v59, %v388_v57 }
  0x73   : > { %v455_v61 = vsel %vm454_vm12, %v453_v60, %v406_v58 }
  0x74   : > { %465 = vst [vmem:[%s733_s27] sm:$0xff] %v455_v61 }
  0x75 PF: > { %s19_s19 = sadd.s32 1, %s675_s19   ;;  %s877_s17 = smov %s671_s18 }
  0x76   : > { %p16_p10 = scmp.ge.s32.totalorder %s19_s19, 4   ;;  %s878_s18 = smov %s880_s0 }
  0x78   :  { %18 = sbr.rel (!%p16_p10) target bundleno = 17 (0x11), region = 71 }

</bundles_post_ra>
